<compile_context>
chip_gen: v5e
topology: v5e:2x2
jax: 0.10.0
libtpu: 0.0.40
codegen_flags: <defaults>
</compile_context>

<pallas_src>
import jax
import jax.numpy as jnp
from jax.experimental import pallas as pl
from jax.experimental.pallas import tpu as pltpu


def _chomp_copy_kernel(x_ref, o_ref):
    # x_ref: (TR, W_in) VMEM tile, o_ref: (TR, W_out) VMEM tile, W_out <= W_in.
    # Static slice of the leading W_out lanes; when W_in == W_out this lowers
    # to a straight tile copy.
    o_ref[...] = x_ref[:, : o_ref.shape[-1]]


def _round_up(a: int, b: int) -> int:
    return (a + b - 1) // b * b


def chomp1d(
    x: jax.Array,
    chomp_size: int,
    *,
    max_col_tile: int = 512,             # lane-dense time tile for long L
    single_block_max_width: int = 2048,  # below this, one column block suffices
    vmem_tile_budget_bytes: int = 4 * 1024 * 1024,  # per (in+out) tile pair
) -> jax.Array:
    """Equivalent of Chomp1d(chomp_size)(x) for x of shape (N, C, L)."""
    n, c, l = x.shape
    assert 0 < chomp_size < l, "chomp_size must be in (0, L)"
    l_out = l - chomp_size
    rows = n * c
    itemsize = jnp.dtype(x.dtype).itemsize
    row_align = max(8, 32 // itemsize)   # f32: 8, bf16: 16, int8: 32 sublanes

    # Flatten (N, C) -> rows so tiling is independent of the channel count.
    x2 = x.reshape(rows, l)

    if l_out <= single_block_max_width:
        # Single lane-dense column block. The chomp lives in the input window:
        # read only the first min(L, round_up(L_out, 128)) columns (either a
        # multiple of 128 or the full L, so the (8,128) rule is satisfied);
        # the output block is the full L_out width.
        w_in = min(l, _round_up(l_out, 128))
        w_out = l_out
        grid_cols = 1
    else:
        # Tile the time axis in 128-multiple tiles. Column j of the output is
        # column j of the input (the chomp only removes the tail), so input
        # and output share the same block index map. The partial last tile is
        # masked on writeback by Pallas.
        w_in = w_out = max_col_tile
        grid_cols = pl.cdiv(l_out, w_out)

    # Row tile: as large as the VMEM budget allows (input + output tile,
    # double-buffered by the default pipeline), sublane-aligned.
    bytes_per_row = (w_in + w_out) * itemsize
    tr = max(1, vmem_tile_budget_bytes // bytes_per_row)
    if tr >= rows:
        tr = rows                                     # full extent: always legal
    else:
        tr = max(row_align, (tr // row_align) * row_align)
    grid_rows = pl.cdiv(rows, tr)

    if grid_cols == 1:
        grid = (grid_rows,)
        in_spec = pl.BlockSpec((tr, w_in), lambda i: (i, 0))
        out_spec = pl.BlockSpec((tr, w_out), lambda i: (i, 0))
        dim_sem = ("parallel",)
    else:
        grid = (grid_rows, grid_cols)
        in_spec = pl.BlockSpec((tr, w_in), lambda i, j: (i, j))
        out_spec = pl.BlockSpec((tr, w_out), lambda i, j: (i, j))
        dim_sem = ("parallel", "parallel")

    out2 = pl.pallas_call(
        _chomp_copy_kernel,
        out_shape=jax.ShapeDtypeStruct((rows, l_out), x.dtype),
        grid_spec=pltpu.PrefetchScalarGridSpec(
            num_scalar_prefetch=0,
            grid=grid,
            in_specs=[in_spec],
            out_specs=out_spec,
        ),
        compiler_params=pltpu.CompilerParams(dimension_semantics=dim_sem),
    )(x2)
    return out2.reshape(n, c, l_out)


if __name__ == "__main__":
    key = jax.random.PRNGKey(0)

    # Primary test: small shapes consistent with the TCN usage (N, C, L).
    batch, channels, seq_len = 2, 4, 16
    chomp_size = 3  # (kernel_size - 1) * dilation in the TCN; any 0 < c < L
    x = jax.random.normal(key, (batch, channels, seq_len), dtype=jnp.float32)

    out = jax.block_until_ready(chomp1d(x, chomp_size))
    ref = x[:, :, :-chomp_size]
    assert out.shape == (batch, channels, seq_len - chomp_size), out.shape
    assert out.dtype == x.dtype
    assert jnp.array_equal(out, ref), "mismatch vs reference slice"

    # Extra small checks exercising the aligned-window and column-tiled paths.
    for (b2, c2, l2, ch2) in [
        (1, 8, 300, 44),    # windowed input: w_in = 256 (< L, multiple of 128)
        (1, 8, 2200, 100),  # column-tiled path (L_out > 2048), 2-axis grid
    ]:
        k2 = jax.random.fold_in(key, l2)
        x2 = jax.random.normal(k2, (b2, c2, l2), dtype=jnp.float32)
        o2 = jax.block_until_ready(chomp1d(x2, ch2))
        assert jnp.array_equal(o2, x2[:, :, :-ch2]), (b2, c2, l2, ch2)

    print("KERNEL_OK")
</pallas_src>

<mosaic_0001>
module attributes {stable_mosaic.version = 11 : i64} {
  func.func @_chomp_copy_kernel(%arg0: i32, %arg1: memref<8x16xf32, #tpu.memory_space<vmem>>, %arg2: memref<8x13xf32, #tpu.memory_space<vmem>>) attributes {dimension_semantics = [#tpu.dimension_semantics<parallel>], iteration_bounds = array<i64: 1>, scalar_prefetch = 0 : i64, scratch_operands = 0 : i64, tpu.core_type = #tpu.core_type<tc>, window_params = [{transform_indices = @transform_0, window_bounds = array<i64: 8, 16>}, {transform_indices = @transform_1, window_bounds = array<i64: 8, 13>}]} {
    %c0 = arith.constant 0 : index
    %c0_0 = arith.constant 0 : index
    %0 = vector.load %arg1[%c0, %c0_0] : memref<8x16xf32, #tpu.memory_space<vmem>>, vector<8x13xf32>
    %c0_1 = arith.constant 0 : index
    %c0_2 = arith.constant 0 : index
    %1 = vector.load %arg2[%c0_1, %c0_2] : memref<8x13xf32, #tpu.memory_space<vmem>>, vector<8x13xf32>
    tpu.vector_store %arg2[%c0_1, %c0_2], %0 {strides = array<i32>} : memref<8x13xf32, #tpu.memory_space<vmem>>, vector<8x13xf32>,
    return
  }
  func.func @transform_0(%arg0: i32) -> (i32, i32) {
    %c0_i32 = arith.constant 0 : i32
    %c0_i32_0 = arith.constant 0 : i32
    return %arg0, %c0_i32 : i32, i32
  }
  func.func @transform_1(%arg0: i32) -> (i32, i32) {
    %c0_i32 = arith.constant 0 : i32
    %c0_i32_0 = arith.constant 0 : i32
    return %arg0, %c0_i32 : i32, i32
  }
}

</mosaic_0001>

<bundles_post_ra>
// kernel: tpu_custom_call.1
= control target key start
LH: loop header
LB: loop body
LE: loop exit
PB: predicated region body
PF: predicated region fallthrough
CT: control target
= control target key end

     0   :  { %6 = vsyncpa [#allocation3], 0  ;;  %s115_s0 = inlined_call_operand.hbm [shape: f32[8,16], index: 0, kind: input, shape index: {}]   ;;  %s116_s1 = inlined_call_operand.hbm [shape: f32[8,13], index: 1, kind: output, shape index: {}]  }
   0x1   :  { %7 = vsyncpa [#allocation4], 0  ;;  %s13_s8 = sshll.u32 %s115_s0, 4  ;;  %s97_s9 = smov [#allocation2]   ;;  %s14_s8 = int_to_ptr.hbm [resolvable:$true] %s13_s8 }
   0x2   :  { %s15_s10 = sshll.u32 %s97_s9, 4  ;;  %s16_s10 = int_to_ptr.vmem [resolvable:$true] %s15_s10 }
   0x3   :  { %18 = dma.hbm_to_vmem [thread:$0]  %s14_s8, 128, %s16_s10, [#allocation3]  }
   0x4   :  { %93 = dma.done.wait [#allocation3], 128  }
   0x5   :  { %94 = vsyncadd [#allocation3], 4294967168  ;;  %s98_s11 = smov [#allocation5]   ;;  %s33_s15 = sshll.u32 %s116_s1, 4  ;;  %vm24_vm0 = vcmask 105472   ;;  %v23_v0 = vld [vmem:[#allocation2] sm:$0xff]  ;;  %s34_s15 = int_to_ptr.hbm [resolvable:$true] %s33_s15 }
   0x6   :  { %s31_s12 = sshll.u32 %s98_s11, 4  ;;  %25 = vst.msk [vmem:[#allocation5] sm:$0xff] %vm24_vm0, %v23_v0  ;;  %s32_s12 = int_to_ptr.vmem [resolvable:$true] %s31_s12 }
   0x7   :  { %36 = dma.vmem_to_hbm [thread:$0]  %s32_s12, 128, %s34_s15, [#allocation4]  }
   0x8   :  { %95 = dma.done.wait [#allocation4], 128  }
   0x9   :  { %96 = vsyncadd [#allocation4], 4294967168 }
   0xa   :  { %41 = vsyncpa [#allocation3], 1 }
   0xb   :  { %42 = vsyncpa [#allocation4], 1 }

</bundles_post_ra>
